<compile_context>
chip_gen: v5e
topology: v5e:2x2
jax: 0.10.0
libtpu: 0.0.40
codegen_flags: <defaults>
</compile_context>

<pallas_src>
import jax
import jax.numpy as jnp
from jax.experimental import pallas as pl
from jax.experimental.pallas import tpu as pltpu

LANES = 128    # vreg lane width: keep the last dim lane-dense
TILE_R = 512   # rows per grid step: 512 * 128 * 4 B = 256 KiB per f32 tile


def linreg_kernel(w_ref, b_ref, x_ref, o_ref):
    # w_ref, b_ref: (1,) f32 scalars in SMEM; x_ref/o_ref: (tile_r, 128) f32
    # tiles in VMEM. One vmul + vadd per vreg on the VPU; kernel is purely
    # HBM-bandwidth-bound, so no MXU / precision tricks.
    o_ref[...] = w_ref[0] * x_ref[...] + b_ref[0]


def _linreg_pallas_2d(x2: jax.Array, weight: jax.Array, bias: jax.Array,
                      tile_r: int) -> jax.Array:
    rows, lanes = x2.shape
    return pl.pallas_call(
        linreg_kernel,
        out_shape=jax.ShapeDtypeStruct((rows, lanes), x2.dtype),
        grid_spec=pl.GridSpec(
            grid=(pl.cdiv(rows, tile_r),),
            in_specs=[
                pl.BlockSpec(memory_space=pltpu.SMEM),           # weight (1,)
                pl.BlockSpec(memory_space=pltpu.SMEM),           # bias   (1,)
                pl.BlockSpec((tile_r, lanes), lambda i: (i, 0)),  # x tile
            ],
            out_specs=pl.BlockSpec((tile_r, lanes), lambda i: (i, 0)),
        ),
        compiler_params=pltpu.CompilerParams(
            dimension_semantics=("parallel",),
        ),
    )(weight, bias, x2)


def linear_regression_forward(x: jax.Array, weight: jax.Array, bias: jax.Array,
                              *, min_pallas_elements: int = 65536) -> jax.Array:
    """y = weight * x + bias, computed in a Pallas TPU kernel for large x."""
    assert weight.shape == (1,) and bias.shape == (1,)
    n = x.size
    if n < min_pallas_elements:
        # Tiny inputs: pallas_call + DMA setup dwarfs the arithmetic.
        return weight * x + bias

    orig_shape = x.shape
    flat = x.reshape(-1)
    rows = pl.cdiv(n, LANES)
    padded = rows * LANES
    if padded != n:
        flat = jnp.pad(flat, (0, padded - n))
    x2 = flat.reshape(rows, LANES)

    tile_r = min(TILE_R, rows)  # full-extent block when the array is small
    y2 = _linreg_pallas_2d(x2, weight, bias, tile_r)
    return y2.reshape(-1)[:n].reshape(orig_shape)


if __name__ == "__main__":
    key = jax.random.PRNGKey(0)
    k_w, k_b, k_x_small, k_x_big = jax.random.split(key, 4)

    # Parameters mirror torch.randn(1) for weight and bias.
    weight = jax.random.normal(k_w, (1,), dtype=jnp.float32)
    bias = jax.random.normal(k_b, (1,), dtype=jnp.float32)

    # 1) Small demo input, matching torch.arange(...).unsqueeze(1) layout:
    #    goes through the cheap plain-JAX fallback path.
    N_small = 16
    x_small = jax.random.normal(k_x_small, (N_small, 1), dtype=jnp.float32)
    y_small = linear_regression_forward(x_small, weight, bias)
    jax.block_until_ready(y_small)
    assert jnp.allclose(y_small, weight * x_small + bias, atol=1e-6, rtol=1e-6)

    # 2) Same small input forced through the Pallas kernel path (exercises the
    #    lane-dense reshape + padding + slice-back on a ragged size).
    y_small_k = linear_regression_forward(x_small, weight, bias,
                                          min_pallas_elements=1)
    jax.block_until_ready(y_small_k)
    assert jnp.allclose(y_small_k, weight * x_small + bias, atol=1e-6, rtol=1e-6)

    # 3) Moderate input above the dispatch threshold: multi-block grid with a
    #    ragged tail in both lanes (70001 % 128 != 0) and rows (547 % 512 != 0).
    N_big = 70_001
    x_big = jax.random.normal(k_x_big, (N_big, 1), dtype=jnp.float32)
    y_big = linear_regression_forward(x_big, weight, bias)
    jax.block_until_ready(y_big)
    assert jnp.allclose(y_big, weight * x_big + bias, atol=1e-5, rtol=1e-5)

    print("KERNEL_OK")
</pallas_src>

<mosaic_0001>
module attributes {stable_mosaic.version = 11 : i64} {
  func.func @linreg_kernel(%arg0: i32, %arg1: memref<1xf32, #tpu.memory_space<smem>>, %arg2: memref<1xf32, #tpu.memory_space<smem>>, %arg3: memref<1x128xf32, #tpu.memory_space<vmem>>, %arg4: memref<1x128xf32, #tpu.memory_space<vmem>>) attributes {dimension_semantics = [#tpu.dimension_semantics<parallel>], iteration_bounds = array<i64: 1>, scalar_prefetch = 0 : i64, scratch_operands = 0 : i64, tpu.core_type = #tpu.core_type<tc>, window_params = [{transform_indices = @transform_0, window_bounds = array<i64: 1>}, {transform_indices = @transform_1, window_bounds = array<i64: 1>}, {transform_indices = @transform_2, window_bounds = array<i64: 1, 128>}, {transform_indices = @transform_3, window_bounds = array<i64: 1, 128>}]} {
    %c0 = arith.constant 0 : index
    %0 = memref.load %arg1[%c0] : memref<1xf32, #tpu.memory_space<smem>>
    %c0_0 = arith.constant 0 : index
    %c0_1 = arith.constant 0 : index
    %1 = vector.load %arg3[%c0_0, %c0_1] : memref<1x128xf32, #tpu.memory_space<vmem>>, vector<1x128xf32>
    %2 = vector.broadcast %0 : f32 to vector<1x128xf32>
    %3 = arith.mulf %2, %1 : vector<1x128xf32>
    %c0_2 = arith.constant 0 : index
    %4 = memref.load %arg2[%c0_2] : memref<1xf32, #tpu.memory_space<smem>>
    %5 = vector.broadcast %4 : f32 to vector<1x128xf32>
    %6 = arith.addf %3, %5 : vector<1x128xf32>
    %c0_3 = arith.constant 0 : index
    %c0_4 = arith.constant 0 : index
    %7 = vector.load %arg4[%c0_3, %c0_4] : memref<1x128xf32, #tpu.memory_space<vmem>>, vector<1x128xf32>
    tpu.vector_store %arg4[%c0_3, %c0_4], %6 {strides = array<i32>} : memref<1x128xf32, #tpu.memory_space<vmem>>, vector<1x128xf32>,
    return
  }
  func.func @transform_0(%arg0: i32) -> i32 {
    %c0_i32 = arith.constant 0 : i32
    %c0_i32_0 = arith.constant 0 : i32
    return %c0_i32 : i32
  }
  func.func @transform_1(%arg0: i32) -> i32 {
    %c0_i32 = arith.constant 0 : i32
    %c0_i32_0 = arith.constant 0 : i32
    return %c0_i32 : i32
  }
  func.func @transform_2(%arg0: i32) -> (i32, i32) {
    %c0_i32 = arith.constant 0 : i32
    %c0_i32_0 = arith.constant 0 : i32
    return %arg0, %c0_i32 : i32, i32
  }
  func.func @transform_3(%arg0: i32) -> (i32, i32) {
    %c0_i32 = arith.constant 0 : i32
    %c0_i32_0 = arith.constant 0 : i32
    return %arg0, %c0_i32 : i32, i32
  }
}

</mosaic_0001>

<bundles_post_ra>
// kernel: tpu_custom_call.1
= control target key start
LH: loop header
LB: loop body
LE: loop exit
PB: predicated region body
PF: predicated region fallthrough
CT: control target
= control target key end

     0   :  { %s101_s0 = inlined_call_operand.<no memory space> [shape: f32[1], index: 0, kind: input, shape index: {}]   ;;  %s102_s1 = inlined_call_operand.<no memory space> [shape: f32[1], index: 1, kind: input, shape index: {}]   ;;  %s103_s2 = inlined_call_operand.vmem [shape: f32[1,128], index: 2, kind: input, shape index: {}]   ;;  %s104_s3 = inlined_call_operand.hbm [shape: f32[1,128], index: 3, kind: output, shape index: {}]  }
   0x1   :  { %v18_v0 = vld [vmem:[%s103_s2] sm:$0x1]  ;;  %v19_v1 = vstv %s101_s0  ;;  %v22_v2 = vstv %s102_s1 }
   0x2   :  { %10 = vsyncpa [#allocation5], 0  ;;  %s32_s20 = sshll.u32 %s104_s3, 4  ;;  %v20_v3 = vmul.f32 %v19_v1, %v18_v0  ;;  %s68_s21 = smov [#allocation4]   ;;  %s33_s20 = int_to_ptr.hbm [resolvable:$true] %s32_s20 }
   0x3   :  { %s30_s22 = sshll.u32 %s68_s21, 4  ;;  %s31_s22 = int_to_ptr.vmem [resolvable:$true] %s30_s22 }
   0x4   :  { %v23_v4 = vadd.f32 %v22_v2, %v20_v3 }
   0x6   :  { %24 = vst [vmem:[#allocation4] sm:$0x1] %v23_v4 }
   0x7   :  { %35 = dma.vmem_to_hbm [thread:$0]  %s31_s22, 16, %s33_s20, [#allocation5]  }
   0x8   :  { %66 = dma.done.wait [#allocation5], 16  }
   0x9   :  { %67 = vsyncadd [#allocation5], 4294967280 }
   0xa   :  { %40 = vsyncpa [#allocation5], 1 }

</bundles_post_ra>
